<compile_context>
chip_gen: v6e
topology: v6e:2x2x1
jax: 0.10.0
libtpu: 0.0.40
codegen_flags: <defaults>
</compile_context>

<pallas_src>
import functools

import jax
import jax.numpy as jnp
from jax import lax
from jax.experimental import pallas as pl
from jax.experimental.pallas import tpu as pltpu


def _round_up(n, m):
    return ((n + m - 1) // m) * m


def _pad2(a, rows, cols):
    r, c = a.shape
    if r == rows and c == cols:
        return a
    return jnp.pad(a, ((0, rows - r), (0, cols - c)))


@functools.lru_cache(maxsize=None)
def _usable_vmem_bytes():
    """Generation-aware VMEM budget (v5e/v6e ~102 MiB usable, v7x ~51 MiB)."""
    try:
        cap = int(pltpu.get_tpu_info().vmem_capacity_bytes)
    except Exception:                      # no TPU info available -> conservative default
        cap = 64 * 2**20
    return max(32 * 2**20, int(cap * 0.8))  # leave headroom for compiler-internal scratch


def _pick_batch_tile(B, Dp, Hp, tb_request):
    """Largest 128-aligned batch tile whose working set fits the VMEM budget."""
    usable = _usable_vmem_bytes()
    tb = min(_round_up(max(int(tb_request), 128), 128), _round_up(B, 128))

    def est(t):
        return (
            (Dp * Hp + Hp * Dp) * 2          # resident bf16 W1 + W2 (single-buffered)
            + 3 * 8 * max(Hp, Dp) * 4        # b1/b2/w3 rows (sublane-padded)
            + 2 * t * Dp * 4                 # f32 x tile, double-buffered
            + 2 * 8 * t * 4                  # (1,1,tb) f32 out tile, double-buffered
            + t * (Hp + Dp) * 4              # fp32 h1/h2 intermediates
        )

    while tb > 128 and est(tb) > 0.9 * usable:
        tb -= 128
    return tb, usable


def mlp_kernel(x_ref, w1_ref, b1_ref, w2_ref, b2_ref, w3_ref, o_ref):
    # x_ref:  (tb, Dp) f32  -> cast to bf16 here (no separate bf16 copy of x in HBM)
    # w1_ref: (Dp, Hp) bf16    b1_ref: (1, Hp) f32
    # w2_ref: (Hp, Dp) bf16    b2_ref: (1, Dp) f32
    # w3_ref: (1, Dp)  f32
    # o_ref:  (1, 1, tb) f32   batch on lanes -> unmasked, lane-dense stores
    x = x_ref[...].astype(jnp.bfloat16)
    h1 = jnp.dot(x, w1_ref[...], preferred_element_type=jnp.float32) + b1_ref[...]
    h1 = jnp.maximum(h1, 0.0)                                         # fp32 ReLU
    h2 = jnp.dot(h1.astype(jnp.bfloat16), w2_ref[...],
                 preferred_element_type=jnp.float32) + b2_ref[...]
    h2 = jnp.maximum(h2, 0.0)                                         # fp32 ReLU
    # Layer 3 (dim -> 1) as an M=1 MXU matmul contracting Dp: the result is already a
    # lane-dense (1, tb) row, so no sublane->lane relayout through the XLU.
    y = lax.dot_general(w3_ref[...], h2, (((1,), (1,)), ((), ())),
                        preferred_element_type=jnp.float32)           # (1, tb)
    o_ref[...] = y[None].astype(o_ref.dtype)                          # (1, 1, tb)


def prepare_params(params):
    """One-time weight layout prep (pad to 128 multiples + bf16 cast).

    Hoisted out of the per-call forward so the conversion runs once, not per call.
    """
    w1, b1, w2, b2, w3, b3 = params
    dim, hidden = w1.shape
    Dp = _round_up(dim, 128)
    Hp = _round_up(hidden, 128)
    w1p = _pad2(jnp.asarray(w1), Dp, Hp).astype(jnp.bfloat16)                 # (Dp, Hp)
    b1p = _pad2(jnp.asarray(b1).reshape(1, hidden), 1, Hp).astype(jnp.float32)
    w2p = _pad2(jnp.asarray(w2), Hp, Dp).astype(jnp.bfloat16)                 # (Hp, Dp)
    b2p = _pad2(jnp.asarray(b2).reshape(1, dim), 1, Dp).astype(jnp.float32)
    w3p = _pad2(jnp.asarray(w3).reshape(1, dim), 1, Dp).astype(jnp.float32)   # (1, Dp)
    b3p = jnp.asarray(b3).reshape(()).astype(jnp.float32)
    return (w1p, b1p, w2p, b2p, w3p, b3p)


@functools.partial(jax.jit, static_argnames=("tb", "vmem_limit"))
def _mlp_forward_impl(x, w1p, b1p, w2p, b2p, w3p, b3, *, tb, vmem_limit):
    B, dim = x.shape
    Dp, Hp = w1p.shape
    Bp = _round_up(B, tb)
    G = Bp // tb

    # x stays f32: only a (cheap) zero-pad when shapes require it; the bf16 cast happens
    # inside the kernel on the VMEM tile, so no duplicate bf16 copy of x hits HBM.
    xp = _pad2(x.astype(jnp.float32), Bp, Dp)

    flops = 2 * Bp * Dp * Hp + 2 * Bp * Hp * Dp + 2 * Bp * Dp
    bytes_accessed = (Bp * Dp * 4 + (Dp * Hp + Hp * Dp) * 2
                      + (Hp + 2 * Dp) * 4 + Bp * 4)

    resident = pl.Buffered(1)   # grid-invariant operands: single-buffer (halves weight VMEM)

    out = pl.pallas_call(
        mlp_kernel,
        out_shape=jax.ShapeDtypeStruct((G, 1, tb), jnp.float32),
        grid_spec=pltpu.PrefetchScalarGridSpec(
            num_scalar_prefetch=0,
            grid=(G,),
            in_specs=[
                pl.BlockSpec((tb, Dp), lambda i: (i, 0)),                          # x tile
                pl.BlockSpec((Dp, Hp), lambda i: (0, 0), pipeline_mode=resident),  # W1
                pl.BlockSpec((1, Hp),  lambda i: (0, 0), pipeline_mode=resident),  # b1
                pl.BlockSpec((Hp, Dp), lambda i: (0, 0), pipeline_mode=resident),  # W2
                pl.BlockSpec((1, Dp),  lambda i: (0, 0), pipeline_mode=resident),  # b2
                pl.BlockSpec((1, Dp),  lambda i: (0, 0), pipeline_mode=resident),  # w3
            ],
            out_specs=pl.BlockSpec((1, 1, tb), lambda i: (i, 0, 0)),
        ),
        compiler_params=pltpu.CompilerParams(
            dimension_semantics=("parallel",),
            vmem_limit_bytes=int(vmem_limit),
        ),
        cost_estimate=pl.CostEstimate(flops=int(flops), transcendentals=0,
                                      bytes_accessed=int(bytes_accessed)),
    )(xp, w1p, b1p, w2p, b2p, w3p)

    # Lane-dense (G, 1, tb) slab -> (B,), drop batch padding, fold in the scalar b3.
    return out.reshape(Bp)[:B] + b3


def mlp_forward(x, prepared_params, *, tb=1024):
    """x: (B, dim) float32, prepared_params from prepare_params().  Returns (B,)."""
    w1p, b1p, w2p, b2p, w3p, b3 = prepared_params
    Dp, Hp = w1p.shape
    # TODO(synk): for dim >~ 1.5K (v7x, 64 MiB VMEM) add a hidden-axis (K)-tiled
    # weight-streaming path (extra 'arbitrary' grid axis + fp32 acc scratch) instead of
    # keeping both full W1/W2 resident; not needed at these sizes.
    tb_sel, vmem_limit = _pick_batch_tile(x.shape[0], Dp, Hp, tb)
    return _mlp_forward_impl(x, w1p, b1p, w2p, b2p, w3p, b3,
                             tb=tb_sel, vmem_limit=vmem_limit)


def init_params(key, dim):
    """torch.nn.Linear-style init: U(-1/sqrt(fan_in), 1/sqrt(fan_in))."""
    def linear(k, fan_in, fan_out):
        kw, kb = jax.random.split(k)
        bound = 1.0 / jnp.sqrt(fan_in)
        w = jax.random.uniform(kw, (fan_in, fan_out), jnp.float32, -bound, bound)
        b = jax.random.uniform(kb, (1, fan_out), jnp.float32, -bound, bound)
        return w, b

    k1, k2, k3 = jax.random.split(key, 3)
    w1, b1 = linear(k1, dim, 2 * dim)
    w2, b2 = linear(k2, 2 * dim, dim)
    w3, b3 = linear(k3, dim, 1)
    return (w1, b1, w2, b2, w3, b3)


if __name__ == "__main__":
    dim = 32
    batch = 8

    key = jax.random.PRNGKey(0)
    kx, kp = jax.random.split(key)
    x = jax.random.normal(kx, (batch, dim), dtype=jnp.float32)
    params = init_params(kp, dim)
    prepped = prepare_params(params)   # one-time weight layout prep (hoisted out of forward)

    y = jax.block_until_ready(mlp_forward(x, prepped))

    # Pure-JAX fp32 reference.  The kernel uses bf16 MXU operands with fp32 accumulation,
    # so allow bf16-level tolerance.
    w1, b1, w2, b2, w3, b3 = params
    h1 = jnp.maximum(x @ w1 + b1, 0.0)
    h2 = jnp.maximum(h1 @ w2 + b2, 0.0)
    ref = (h2 @ w3 + b3)[:, 0]
    assert y.shape == (batch,)
    assert jnp.allclose(y, ref, atol=5e-2, rtol=5e-2), (y, ref)

    print("KERNEL_OK")
</pallas_src>

<mosaic_0001>
module attributes {stable_mosaic.version = 11 : i64} {
  func.func @mlp_kernel(%arg0: i32, %arg1: memref<128x128xf32, #tpu.memory_space<vmem>>, %arg2: memref<128x128xbf16, #tpu.memory_space<vmem>>, %arg3: memref<1x128xf32, #tpu.memory_space<vmem>>, %arg4: memref<128x128xbf16, #tpu.memory_space<vmem>>, %arg5: memref<1x128xf32, #tpu.memory_space<vmem>>, %arg6: memref<1x128xf32, #tpu.memory_space<vmem>>, %arg7: memref<1x1x128xf32, #tpu.memory_space<vmem>>) attributes {dimension_semantics = [#tpu.dimension_semantics<parallel>], iteration_bounds = array<i64: 1>, scalar_prefetch = 0 : i64, scratch_operands = 0 : i64, tpu.core_type = #tpu.core_type<tc>, window_params = [{transform_indices = @transform_0, window_bounds = array<i64: 128, 128>}, {pipeline_mode = #tpu.pipeline_mode<synchronous>, transform_indices = @transform_1, window_bounds = array<i64: 128, 128>}, {pipeline_mode = #tpu.pipeline_mode<synchronous>, transform_indices = @transform_2, window_bounds = array<i64: 1, 128>}, {pipeline_mode = #tpu.pipeline_mode<synchronous>, transform_indices = @transform_3, window_bounds = array<i64: 128, 128>}, {pipeline_mode = #tpu.pipeline_mode<synchronous>, transform_indices = @transform_4, window_bounds = array<i64: 1, 128>}, {pipeline_mode = #tpu.pipeline_mode<synchronous>, transform_indices = @transform_5, window_bounds = array<i64: 1, 128>}, {transform_indices = @transform_6, window_bounds = array<i64: 1, 1, 128>}]} {
    %c0 = arith.constant 0 : index
    %c0_0 = arith.constant 0 : index
    %0 = vector.load %arg1[%c0, %c0_0] : memref<128x128xf32, #tpu.memory_space<vmem>>, vector<128x128xf32>
    %1 = arith.truncf %0 : vector<128x128xf32> to vector<128x128xbf16>
    %c0_1 = arith.constant 0 : index
    %c0_2 = arith.constant 0 : index
    %2 = vector.load %arg2[%c0_1, %c0_2] : memref<128x128xbf16, #tpu.memory_space<vmem>>, vector<128x128xbf16>
    %cst = arith.constant dense<0.000000e+00> : vector<128x128xf32>
    %3 = tpu.matmul %1, %2, %cst {dimension_numbers = #tpu.dot_dimension_numbers<[1], [0], [0], [1], [0, 0, 1, 1], [], []>} : vector<128x128xbf16>, vector<128x128xbf16>, vector<128x128xf32> -> vector<128x128xf32>
    %c0_3 = arith.constant 0 : index
    %c0_4 = arith.constant 0 : index
    %4 = vector.load %arg3[%c0_3, %c0_4] : memref<1x128xf32, #tpu.memory_space<vmem>>, vector<1x128xf32>
    %5 = vector.broadcast %4 : vector<1x128xf32> to vector<128x128xf32>
    %6 = arith.addf %3, %5 : vector<128x128xf32>
    %cst_5 = arith.constant 0.000000e+00 : f32
    %7 = vector.broadcast %cst_5 : f32 to vector<128x128xf32>
    %8 = arith.maximumf %6, %7 : vector<128x128xf32>
    %9 = arith.truncf %8 : vector<128x128xf32> to vector<128x128xbf16>
    %c0_6 = arith.constant 0 : index
    %c0_7 = arith.constant 0 : index
    %10 = vector.load %arg4[%c0_6, %c0_7] : memref<128x128xbf16, #tpu.memory_space<vmem>>, vector<128x128xbf16>
    %cst_8 = arith.constant dense<0.000000e+00> : vector<128x128xf32>
    %11 = tpu.matmul %9, %10, %cst_8 {dimension_numbers = #tpu.dot_dimension_numbers<[1], [0], [0], [1], [0, 0, 1, 1], [], []>} : vector<128x128xbf16>, vector<128x128xbf16>, vector<128x128xf32> -> vector<128x128xf32>
    %c0_9 = arith.constant 0 : index
    %c0_10 = arith.constant 0 : index
    %12 = vector.load %arg5[%c0_9, %c0_10] : memref<1x128xf32, #tpu.memory_space<vmem>>, vector<1x128xf32>
    %13 = vector.broadcast %12 : vector<1x128xf32> to vector<128x128xf32>
    %14 = arith.addf %11, %13 : vector<128x128xf32>
    %cst_11 = arith.constant 0.000000e+00 : f32
    %15 = vector.broadcast %cst_11 : f32 to vector<128x128xf32>
    %16 = arith.maximumf %14, %15 : vector<128x128xf32>
    %c0_12 = arith.constant 0 : index
    %c0_13 = arith.constant 0 : index
    %17 = vector.load %arg6[%c0_12, %c0_13] : memref<1x128xf32, #tpu.memory_space<vmem>>, vector<1x128xf32>
    %cst_14 = arith.constant dense<0.000000e+00> : vector<1x128xf32>
    %18 = tpu.matmul %17, %16, %cst_14 {dimension_numbers = #tpu.dot_dimension_numbers<[1], [1], [0], [0], [0, 0, 1, 0], [], []>} : vector<1x128xf32>, vector<128x128xf32>, vector<1x128xf32> -> vector<1x128xf32>
    %19 = vector.shape_cast %18 : vector<1x128xf32> to vector<1x1x128xf32>
    %c0_15 = arith.constant 0 : index
    %c0_16 = arith.constant 0 : index
    %c0_17 = arith.constant 0 : index
    %20 = vector.load %arg7[%c0_15, %c0_16, %c0_17] : memref<1x1x128xf32, #tpu.memory_space<vmem>>, vector<1x1x128xf32>
    tpu.vector_store %arg7[%c0_15, %c0_16, %c0_17], %19 {strides = array<i32>} : memref<1x1x128xf32, #tpu.memory_space<vmem>>, vector<1x1x128xf32>,
    return
  }
  func.func @transform_0(%arg0: i32) -> (i32, i32) {
    %c0_i32 = arith.constant 0 : i32
    %c0_i32_0 = arith.constant 0 : i32
    return %arg0, %c0_i32 : i32, i32
  }
  func.func @transform_1(%arg0: i32) -> (i32, i32) {
    %c0_i32 = arith.constant 0 : i32
    %c0_i32_0 = arith.constant 0 : i32
    %c0_i32_1 = arith.constant 0 : i32
    return %c0_i32, %c0_i32_0 : i32, i32
  }
  func.func @transform_2(%arg0: i32) -> (i32, i32) {
    %c0_i32 = arith.constant 0 : i32
    %c0_i32_0 = arith.constant 0 : i32
    %c0_i32_1 = arith.constant 0 : i32
    return %c0_i32, %c0_i32_0 : i32, i32
  }
  func.func @transform_3(%arg0: i32) -> (i32, i32) {
    %c0_i32 = arith.constant 0 : i32
    %c0_i32_0 = arith.constant 0 : i32
    %c0_i32_1 = arith.constant 0 : i32
    return %c0_i32, %c0_i32_0 : i32, i32
  }
  func.func @transform_4(%arg0: i32) -> (i32, i32) {
    %c0_i32 = arith.constant 0 : i32
    %c0_i32_0 = arith.constant 0 : i32
    %c0_i32_1 = arith.constant 0 : i32
    return %c0_i32, %c0_i32_0 : i32, i32
  }
  func.func @transform_5(%arg0: i32) -> (i32, i32) {
    %c0_i32 = arith.constant 0 : i32
    %c0_i32_0 = arith.constant 0 : i32
    %c0_i32_1 = arith.constant 0 : i32
    return %c0_i32, %c0_i32_0 : i32, i32
  }
  func.func @transform_6(%arg0: i32) -> (i32, i32, i32) {
    %c0_i32 = arith.constant 0 : i32
    %c0_i32_0 = arith.constant 0 : i32
    %c0_i32_1 = arith.constant 0 : i32
    return %arg0, %c0_i32, %c0_i32_0 : i32, i32, i32
  }
}

</mosaic_0001>

<bundles_post_ra>
// kernel: _mlp_forward_impl.1
= control target key start
LH: loop header
LB: loop body
LE: loop exit
PB: predicated region body
PF: predicated region fallthrough
CT: control target
= control target key end

     0   :  { %vm685_vm0 = vmmov 0   ;;  %s855_s1 = inlined_call_operand.vmem [shape: bf16[128,128], index: 1, kind: input, shape index: {}]   ;;  %s856_s0 = inlined_call_operand.vmem [shape: f32[128,128], index: 0, kind: input, shape index: {}]   ;;  %s857_s3 = inlined_call_operand.vmem [shape: bf16[128,128], index: 3, kind: input, shape index: {}]   ;;  %s858_s2 = inlined_call_operand.vmem [shape: f32[1,128], index: 2, kind: input, shape index: {}]   ;;  %s859_s4 = inlined_call_operand.vmem [shape: f32[1,128], index: 4, kind: input, shape index: {}]   ;;  %s860_s5 = inlined_call_operand.vmem [shape: f32[1,128], index: 5, kind: input, shape index: {}]   ;;  %s861_s6 = inlined_call_operand.vmem [shape: f32[1,1,128], index: 6, kind: output, shape index: {}]  }
   0x1   :  { %v668_v0 = vld [vmem:[%s855_s1 + $0x38] sm:$0xff]   ;;  %v669_v1 = vld [vmem:[%s855_s1 + $0x30] sm:$0xff]   ;;  %v670_v2 = vld [vmem:[%s855_s1 + $0x28] sm:$0xff]  }
   0x2   :  { %567 = vmatprep.subr.bf16.mxu1 %v668_v0  ;;  %v671_v3 = vld [vmem:[%s855_s1 + $0x20] sm:$0xff]   ;;  %v25_v5 = vld [vmem:[%s856_s0 + $0x8] sm:$0xff]  ;;  %v672_v7 = vld [vmem:[%s855_s1 + $0x18] sm:$0xff]  }
   0x3   :  { %568 = vmatpush3.bf16.msra.mxu1 %v668_v0  ;;  %v24_v4 = vld [vmem:[%s856_s0] sm:$0xff]  ;;  %v673_v8 = vld [vmem:[%s855_s1 + $0x10] sm:$0xff]   ;;  %v674_v9 = vld [vmem:[%s855_s1 + $0x8] sm:$0xff]  }
   0x4   :  { %569 = vmatprep.subr.bf16.mxu1 %v669_v1  ;;  %v40_v6 = vpack.c.bf16 %v25_v5, %v24_v4  ;;  %v675_v10 = vld [vmem:[%s855_s1] sm:$0xff]   ;;  %v26_v11 = vld [vmem:[%s856_s0 + $0x10] sm:$0xff]  ;;  %v27_v12 = vld [vmem:[%s856_s0 + $0x18] sm:$0xff] }
   0x5   :  { %v28_v13 = vld [vmem:[%s856_s0 + $0x20] sm:$0xff]  ;;  %v29_v14 = vld [vmem:[%s856_s0 + $0x28] sm:$0xff]  ;;  %v676_v15 = vld [vmem:[%s857_s3 + $0x38] sm:$0xff]   ;;  %v41_v16 = vpack.c.bf16 %v27_v12, %v26_v11 }
   0x6   :  { %583 = vmatprep.mubr.bf16.mxu1 %v40_v6  ;;  %v42_v17 = vpack.c.bf16 %v29_v14, %v28_v13  ;;  %v677_v18 = vld [vmem:[%s857_s3 + $0x30] sm:$0xff]   ;;  %v31_v20 = vld [vmem:[%s856_s0 + $0x38] sm:$0xff]  ;;  %v32_v21 = vld [vmem:[%s856_s0 + $0x40] sm:$0xff] }
   0x7   :  { %570 = vmatpush3.bf16.msra.mxu1 %v669_v1  ;;  %v30_v19 = vld [vmem:[%s856_s0 + $0x30] sm:$0xff]  ;;  %v33_v22 = vld [vmem:[%s856_s0 + $0x48] sm:$0xff]  ;;  %v679_v26 = vld [vmem:[%s857_s3 + $0x20] sm:$0xff]  }
   0x8   :  { %571 = vmatprep.subr.bf16.mxu1 %v670_v2  ;;  %v678_v23 = vld [vmem:[%s857_s3 + $0x28] sm:$0xff]   ;;  %v43_v24 = vpack.c.bf16 %v31_v20, %v30_v19  ;;  %v44_v25 = vpack.c.bf16 %v33_v22, %v32_v21  ;;  %v34_v27 = vld [vmem:[%s856_s0 + $0x50] sm:$0xff]  ;;  %v35_v28 = vld [vmem:[%s856_s0 + $0x58] sm:$0xff] }
   0x9   :  { %v36_v29 = vld [vmem:[%s856_s0 + $0x60] sm:$0xff]  ;;  %v37_v30 = vld [vmem:[%s856_s0 + $0x68] sm:$0xff]  ;;  %v680_v31 = vld [vmem:[%s857_s3 + $0x18] sm:$0xff]   ;;  %v45_v32 = vpack.c.bf16 %v35_v28, %v34_v27 }
   0xa   :  { %v46_v33 = vpack.c.bf16 %v37_v30, %v36_v29  ;;  %v38_v34 = vld [vmem:[%s856_s0 + $0x70] sm:$0xff]  ;;  %v39_v35 = vld [vmem:[%s856_s0 + $0x78] sm:$0xff]  ;;  %v682_v38 = vld [vmem:[%s857_s3 + $0x8] sm:$0xff]  }
   0xb   :  { %572 = vmatpush3.bf16.msra.mxu1 %v670_v2  ;;  %v47_v36 = vpack.c.bf16 %v39_v35, %v38_v34  ;;  %v681_v37 = vld [vmem:[%s857_s3 + $0x10] sm:$0xff]   ;;  %v683_v39 = vld [vmem:[%s857_s3] sm:$0xff]  }
   0xc   :  { %573 = vmatprep.subr.bf16.mxu1 %v671_v3  ;;  %v500_v42 = vld [vmem:[%s858_s2] ss:$0 sm:$0xff] }
   0xf   :  { %574 = vmatpush3.bf16.msra.mxu1 %v671_v3 }
  0x10   :  { %575 = vmatprep.subr.bf16.mxu1 %v672_v7 }
  0x13   :  { %576 = vmatpush3.bf16.msra.mxu1 %v672_v7 }
  0x14   :  { %577 = vmatprep.subr.bf16.mxu1 %v673_v8 }
  0x17   :  { %578 = vmatpush3.bf16.msra.mxu1 %v673_v8 }
  0x18   :  { %579 = vmatprep.subr.bf16.mxu1 %v674_v9 }
  0x1b   :  { %580 = vmatpush3.bf16.msra.mxu1 %v674_v9 }
  0x1c   :  { %581 = vmatprep.subr.bf16.mxu1 %v675_v10 }
  0x1f   :  { %582 = vmatpush3.bf16.msra.mxu1 %v675_v10 }
  0x20   :  { %599 = vmatprep.subr.bf16.mxu1 %v676_v15 }
  0x22   :  { %584 = vmatmul.mubr.bf16.vlgmr.msra.gmra.mxu1 %v41_v16 }
  0x23   :  { %587 = vmatprep.mubr.bf16.mxu1 %v42_v17  ;;  %600 = vmatpush3.bf16.msra.mxu1 %v676_v15 }
  0x24   :  { %601 = vmatprep.subr.bf16.mxu1 %v677_v18 }
  0x27   :  { %602 = vmatpush3.bf16.msra.mxu1 %v677_v18 }
  0x28   :  { %603 = vmatprep.subr.bf16.mxu1 %v678_v23 }
  0x2a   :  { %588 = vmatmul.mubr.bf16.gmra.mxu1 %v43_v24 }
  0x2b   :  { %591 = vmatprep.mubr.bf16.mxu1 %v44_v25  ;;  %604 = vmatpush3.bf16.msra.mxu1 %v678_v23 }
  0x2c   :  { %605 = vmatprep.subr.bf16.mxu1 %v679_v26 }
  0x2f   :  { %606 = vmatpush3.bf16.msra.mxu1 %v679_v26 }
  0x30   :  { %607 = vmatprep.subr.bf16.mxu1 %v680_v31 }
  0x32   :  { %592 = vmatmul.mubr.bf16.gmra.mxu1 %v45_v32 }
  0x33   :  { %595 = vmatprep.mubr.bf16.mxu1 %v46_v33  ;;  %608 = vmatpush3.bf16.msra.mxu1 %v680_v31  ;;  %v684_v33 = vmov 0.0  }
  0x34   :  { %609 = vmatprep.subr.bf16.mxu1 %v681_v37  ;;  %631 = vmatprep.subr.mxu0 %v684_v33 }
  0x35   :  { %663 = vmatprep.mubr.msk.f32.mxu0 %vm685_vm0, %v684_v33 }
  0x37   :  { %610 = vmatpush3.bf16.msra.mxu1 %v681_v37 }
  0x38   :  { %611 = vmatprep.subr.bf16.mxu1 %v682_v38 }
  0x3a   :  { %596 = vmatmul.mubr.bf16.gmra.mxu1 %v47_v36 }
  0x3b   :  { %612 = vmatpush3.bf16.msra.mxu1 %v682_v38 }
  0x3c   :  { %613 = vmatprep.subr.bf16.mxu1 %v683_v39 }
  0x3f   :  { %614 = vmatpush3.bf16.msra.mxu1 %v683_v39 }
  0xe2   :  { %v585_v40 = vpop.f32.mrf.mxu1 }
  0xe3   :  { %v162_v46 = vadd.f32 %v585_v40, %v500_v42 }
  0xe4   :  { %v153_v41 = vpop.f32.mrf.mxu1 }
  0xe5   :  { %v154_v44 = vadd.f32 %v500_v42, %v153_v41  ;;  %v218_v53 = vmax.f32 %v162_v46, 0.0 }
  0xe6   :  { %v586_v43 = vpop.f32.mrf.mxu1 }
  0xe7   :  { %v165_v45 = vadd.f32 %v586_v43, %v500_v42  ;;  %v216_v51 = vmax.f32 %v154_v44, 0.0 }
  0xe8   :  { %v156_v47 = vpop.f32.mrf.mxu1 }
  0xe9   :  { %v157_v48 = vadd.f32 %v500_v42, %v156_v47  ;;  %v219_v49 = vmax.f32 %v165_v45, 0.0 }
  0xea   :  { %v589_v50 = vpop.f32.mrf.mxu1 }
  0xeb   :  { %v217_v52 = vmax.f32 %v157_v48, 0.0  ;;  %v233_v56 = vpack.c.bf16 %v219_v49, %v218_v53  ;;  %v178_v60 = vadd.f32 %v589_v50, %v500_v42  ;;  %v509_v48 = vld [vmem:[%s859_s4] ss:$0 sm:$0xff] }
  0xec   :  { %v169_v54 = vpop.f32.mrf.mxu1 }
  0xed   :  { %v232_v55 = vpack.c.bf16 %v217_v52, %v216_v51  ;;  %v170_v58 = vadd.f32 %v500_v42, %v169_v54  ;;  %v222_v3 = vmax.f32 %v178_v60, 0.0 }
  0xee   :  { %v590_v57 = vpop.f32.mrf.mxu1 }
  0xef   :  { %v181_v59 = vadd.f32 %v590_v57, %v500_v42  ;;  %615 = vmatprep.mubr.bf16.mxu1 %v232_v55  ;;  %v220_v1 = vmax.f32 %v170_v58, 0.0 }
  0xf0   :  { %v172_v61 = vpop.f32.mrf.mxu1  ;;  %616 = vmatmul.mubr.bf16.vlgmr.msra.gmra.mxu1 %v233_v56 }
  0xf1   :  { %v173_v62 = vadd.f32 %v500_v42, %v172_v61  ;;  %v223_v63 = vmax.f32 %v181_v59, 0.0 }
  0xf2   :  { %v593_v0 = vpop.f32.mrf.mxu1 }
  0xf3   :  { %v221_v2 = vmax.f32 %v173_v62, 0.0  ;;  %v235_v6 = vpack.c.bf16 %v223_v63, %v222_v3  ;;  %v194_v10 = vadd.f32 %v593_v0, %v500_v42 }
  0xf4   :  { %v185_v4 = vpop.f32.mrf.mxu1 }
  0xf5   :  { %v234_v5 = vpack.c.bf16 %v221_v2, %v220_v1  ;;  %v186_v8 = vadd.f32 %v500_v42, %v185_v4  ;;  %v226_v17 = vmax.f32 %v194_v10, 0.0 }
  0xf6   :  { %v594_v7 = vpop.f32.mrf.mxu1 }
  0xf7   :  { %v197_v9 = vadd.f32 %v594_v7, %v500_v42  ;;  %619 = vmatprep.mubr.bf16.mxu1 %v234_v5  ;;  %v224_v15 = vmax.f32 %v186_v8, 0.0 }
  0xf8   :  { %v188_v11 = vpop.f32.mrf.mxu1  ;;  %620 = vmatmul.mubr.bf16.gmra.mxu1 %v235_v6 }
  0xf9   :  { %v189_v12 = vadd.f32 %v500_v42, %v188_v11  ;;  %v227_v13 = vmax.f32 %v197_v9, 0.0 }
  0xfa   :  { %v597_v14 = vpop.f32.mrf.mxu1 }
  0xfb   :  { %v225_v16 = vmax.f32 %v189_v12, 0.0  ;;  %v237_v20 = vpack.c.bf16 %v227_v13, %v226_v17  ;;  %v210_v24 = vadd.f32 %v597_v14, %v500_v42 }
  0xfc   :  { %v201_v18 = vpop.f32.mrf.mxu1 }
  0xfd   :  { %v236_v19 = vpack.c.bf16 %v225_v16, %v224_v15  ;;  %v202_v22 = vadd.f32 %v500_v42, %v201_v18  ;;  %v230_v30 = vmax.f32 %v210_v24, 0.0 }
  0xfe   :  { %v598_v21 = vpop.f32.mrf.mxu1 }
  0xff   :  { %v213_v23 = vadd.f32 %v598_v21, %v500_v42  ;;  %623 = vmatprep.mubr.bf16.mxu1 %v236_v19  ;;  %v228_v28 = vmax.f32 %v202_v22, 0.0  ;;  %v424_v19 = vld [vmem:[%s860_s5] sm:$0x1] }
 0x100   :  { %v204_v25 = vpop.f32.mrf.mxu1  ;;  %624 = vmatmul.mubr.bf16.gmra.mxu1 %v237_v20 }
 0x101   :  { %v205_v26 = vadd.f32 %v500_v42, %v204_v25  ;;  %v231_v27 = vmax.f32 %v213_v23, 0.0 }
 0x103   :  { %v229_v29 = vmax.f32 %v205_v26, 0.0  ;;  %v239_v32 = vpack.c.bf16 %v231_v27, %v230_v30 }
 0x105   :  { %v238_v31 = vpack.c.bf16 %v229_v29, %v228_v28 }
 0x107   :  { %627 = vmatprep.mubr.bf16.mxu1 %v238_v31 }
 0x108   :  { %628 = vmatmul.mubr.bf16.gmra.mxu1 %v239_v32 }
 0x1b0   :  { %v822_v34 = vpop.f32.mrf.mxu1 }
 0x1b1   :  { %v354_v12 = vadd.f32 %v822_v34, %v509_v48 }
 0x1b2   :  { %v824_v35 = vpop.f32.mrf.mxu1 }
 0x1b3   :  { %v410_v14 = vmax.f32 %v354_v12, 0.0  ;;  %v346_v16 = vadd.f32 %v509_v48, %v824_v35 }
 0x1b4   :  { %v618_v36 = vpop.f32.mrf.mxu1 }
 0x1b5   :  { %v357_v10 = vadd.f32 %v618_v36, %v509_v48  ;;  %v408_v18 = vmax.f32 %v346_v16, 0.0 }
 0x1b6   :  { %v826_v37 = vpop.f32.mrf.mxu1 }
 0x1b7   :  { %v411_v13 = vmax.f32 %v357_v10, 0.0  ;;  %v349_v15 = vadd.f32 %v509_v48, %v826_v37 }
 0x1b8   :  { %v621_v38 = vpop.f32.mrf.mxu1 }
 0x1b9   :  { %v370_v4 = vadd.f32 %v621_v38, %v509_v48  ;;  %v409_v17 = vmax.f32 %v349_v15, 0.0 }
 0x1ba   :  { %v361_v39 = vpop.f32.mrf.mxu1 }
 0x1bb   :  { %v414_v6 = vmax.f32 %v370_v4, 0.0  ;;  %v362_v8 = vadd.f32 %v509_v48, %v361_v39 }
 0x1bc   :  { %v622_v40 = vpop.f32.mrf.mxu1 }
 0x1bd   :  { %v373_v2 = vadd.f32 %v622_v40, %v509_v48  ;;  %v412_v11 = vmax.f32 %v362_v8, 0.0 }
 0x1be   :  { %v364_v41 = vpop.f32.mrf.mxu1 }
 0x1bf   :  { %v415_v5 = vmax.f32 %v373_v2, 0.0  ;;  %v365_v7 = vadd.f32 %v509_v48, %v364_v41 }
 0x1c0   :  { %v625_v42 = vpop.f32.mrf.mxu1 }
 0x1c1   :  { %v386_v60 = vadd.f32 %v625_v42, %v509_v48  ;;  %v413_v9 = vmax.f32 %v365_v7, 0.0 }
 0x1c2   :  { %v377_v43 = vpop.f32.mrf.mxu1 }
 0x1c3   :  { %v418_v62 = vmax.f32 %v386_v60, 0.0  ;;  %v378_v0 = vadd.f32 %v509_v48, %v377_v43 }
 0x1c4   :  { %v626_v44 = vpop.f32.mrf.mxu1 }
 0x1c5   :  { %v389_v58 = vadd.f32 %v626_v44, %v509_v48  ;;  %v416_v3 = vmax.f32 %v378_v0, 0.0 }
 0x1c6   :  { %v380_v45 = vpop.f32.mrf.mxu1 }
 0x1c7   :  { %v419_v61 = vmax.f32 %v389_v58, 0.0  ;;  %v381_v63 = vadd.f32 %v509_v48, %v380_v45 }
 0x1c8   :  { %v629_v46 = vpop.f32.mrf.mxu1 }
 0x1c9   :  { %v402_v51 = vadd.f32 %v629_v46, %v509_v48  ;;  %v417_v1 = vmax.f32 %v381_v63, 0.0 }
 0x1ca   :  { %v393_v47 = vpop.f32.mrf.mxu1 }
 0x1cb   :  { %v422_v54 = vmax.f32 %v402_v51, 0.0  ;;  %v394_v56 = vadd.f32 %v509_v48, %v393_v47 }
 0x1cc   :  { %v630_v49 = vpop.f32.mrf.mxu1 }
 0x1cd   :  { %v405_v50 = vadd.f32 %v630_v49, %v509_v48  ;;  %v420_v59 = vmax.f32 %v394_v56, 0.0 }
 0x1ce   :  { %v396_v53 = vpop.f32.mrf.mxu1 }
 0x1cf   :  { %v423_v52 = vmax.f32 %v405_v50, 0.0  ;;  %v397_v55 = vadd.f32 %v509_v48, %v396_v53 }
 0x1d1   :  { %632 = vmatpush3.xpose.msra.mxu0 %v423_v52  ;;  %v421_v57 = vmax.f32 %v397_v55, 0.0 }
 0x1d2   :  { %633 = vmatprep.subr.mxu0 %v684_v33 }
 0x1d5   :  { %634 = vmatpush3.xpose.msra.mxu0 %v422_v54 }
 0x1d6   :  { %635 = vmatprep.subr.mxu0 %v684_v33 }
 0x1d9   :  { %636 = vmatpush3.xpose.msra.mxu0 %v421_v57 }
 0x1da   :  { %637 = vmatprep.subr.mxu0 %v684_v33 }
 0x1dd   :  { %638 = vmatpush3.xpose.msra.mxu0 %v420_v59 }
 0x1de   :  { %639 = vmatprep.subr.mxu0 %v684_v33 }
 0x1e1   :  { %640 = vmatpush3.xpose.msra.mxu0 %v419_v61 }
 0x1e2   :  { %641 = vmatprep.subr.mxu0 %v684_v33 }
 0x1e5   :  { %642 = vmatpush3.xpose.msra.mxu0 %v418_v62 }
 0x1e6   :  { %643 = vmatprep.subr.mxu0 %v684_v33 }
 0x1e9   :  { %644 = vmatpush3.xpose.msra.mxu0 %v417_v1 }
 0x1ea   :  { %645 = vmatprep.subr.mxu0 %v684_v33 }
 0x1ed   :  { %646 = vmatpush3.xpose.msra.mxu0 %v416_v3 }
 0x1ee   :  { %647 = vmatprep.subr.mxu0 %v684_v33 }
 0x1f1   :  { %648 = vmatpush3.xpose.msra.mxu0 %v415_v5 }
 0x1f2   :  { %649 = vmatprep.subr.mxu0 %v684_v33 }
 0x1f5   :  { %650 = vmatpush3.xpose.msra.mxu0 %v414_v6 }
 0x1f6   :  { %651 = vmatprep.subr.mxu0 %v684_v33 }
 0x1f9   :  { %652 = vmatpush3.xpose.msra.mxu0 %v413_v9 }
 0x1fa   :  { %653 = vmatprep.subr.mxu0 %v684_v33 }
 0x1fd   :  { %654 = vmatpush3.xpose.msra.mxu0 %v412_v11 }
 0x1fe   :  { %655 = vmatprep.subr.mxu0 %v684_v33 }
 0x201   :  { %656 = vmatpush3.xpose.msra.mxu0 %v411_v13 }
 0x202   :  { %657 = vmatprep.subr.mxu0 %v684_v33 }
 0x205   :  { %658 = vmatpush3.xpose.msra.mxu0 %v410_v14 }
 0x206   :  { %659 = vmatprep.subr.mxu0 %v684_v33 }
 0x209   :  { %660 = vmatpush3.xpose.msra.mxu0 %v409_v17 }
 0x20a   :  { %661 = vmatprep.subr.mxu0 %v684_v33 }
 0x20d   :  { %662 = vmatpush3.xpose.msra.mxu0 %v408_v18 }
 0x210   :  { %664 = vmatmul.mubr.f32.vlgmr.msra.gmra.mxu0 %v424_v19 }
 0x2d0   :  { %v491_v20 = vpop.f32.mrf.mxu0 }
 0x2d1   :  { %495 = vst [vmem:[%s861_s6] sm:$0x1] %v491_v20 }
 0x2d2   :  { %v665_v21 = vpop.f32.mrf.mxu0 }

</bundles_post_ra>
